<compile_context>
chip_gen: v7x
topology: tpu7x:2x2x1
jax: 0.10.0
libtpu: 0.0.40
codegen_flags: <defaults>
</compile_context>

<pallas_src>
import functools

import jax
import jax.numpy as jnp
from jax.experimental import pallas as pl
from jax.experimental.pallas import tpu as pltpu


def _start_logits_kernel(h_ref, w_ref, b_ref, pmask_ref, out_ref, *, mask_value):
    # h_ref:     (B, TILE_S, H)  native dtype (f32 / bf16 / fp16)
    # w_ref:     (1, H)          f32, resident across grid steps
    # b_ref:     (1,)            f32, SMEM scalar
    # pmask_ref: (B, TILE_S)     native dtype
    # out_ref:   (B, TILE_S)     hidden_states.dtype
    h = h_ref[...].astype(jnp.float32)               # upcast in-register
    w = w_ref[...]                                    # (1, H) f32
    b = b_ref[0]                                      # scalar from SMEM
    # dense(hidden).squeeze(-1): contract over the hidden (lane) dim.
    x = jnp.sum(h * w[None, :, :], axis=-1) + b       # (B, TILE_S) f32
    # x * (1 - p_mask) - mask_value * p_mask
    p = pmask_ref[...].astype(jnp.float32)
    out_ref[...] = (x * (1.0 - p) - mask_value * p).astype(out_ref.dtype)


def _pick_tile_s(B, S, H, itemsize, budget_bytes=4 << 20):
    """Largest power-of-two sequence tile (>=128) whose h-block fits the budget.

    Small sequences (S <= 128) use the full S as one block (block dims equal
    the array dims, so the (8,128) BlockSpec rule is satisfied).
    """
    if S <= 128:
        return S
    tile = 128
    while (tile * 2 <= S
           and B * (tile * 2) * H * itemsize <= budget_bytes
           and tile < 1024):
        tile *= 2
    return tile


def pooler_start_logits(hidden_states, weight, bias, p_mask=None):
    """hidden_states: (B, S, H); weight: (1, H); bias: (1,); p_mask: (B, S) or None."""
    B, S, H = hidden_states.shape
    itemsize = jnp.dtype(hidden_states.dtype).itemsize
    tile_s = _pick_tile_s(B, S, H, itemsize)
    grid = (pl.cdiv(S, tile_s),)

    # PyTorch branches on the parameter dtype: fp16 -> -65500, else -1e30.
    mask_value = 65500.0 if jnp.dtype(weight.dtype) == jnp.float16 else 1e30

    w2d = weight.reshape(1, H).astype(jnp.float32)   # tiny, resident in VMEM
    b1d = bias.reshape(1).astype(jnp.float32)        # scalar, lives in SMEM
    if p_mask is None:
        p_mask = jnp.zeros((B, S), dtype=jnp.float32)

    kernel = functools.partial(_start_logits_kernel, mask_value=mask_value)

    return pl.pallas_call(
        kernel,
        out_shape=jax.ShapeDtypeStruct((B, S), hidden_states.dtype),
        grid_spec=pltpu.PrefetchScalarGridSpec(
            num_scalar_prefetch=0,
            grid=grid,
            in_specs=[
                # hidden_states: tiled over S, native dtype (no wrapper upcast).
                pl.BlockSpec((B, tile_s, H), lambda s: (0, s, 0)),
                # weight: constant index_map -> stays resident across grid steps.
                pl.BlockSpec((1, H), lambda s: (0, 0)),
                # bias: scalar path via SMEM.
                pl.BlockSpec(memory_space=pltpu.SMEM),
                # p_mask: tiled over S.
                pl.BlockSpec((B, tile_s), lambda s: (0, s)),
            ],
            out_specs=pl.BlockSpec((B, tile_s), lambda s: (0, s)),
        ),
        compiler_params=pltpu.CompilerParams(
            # Every S tile is independent -> shard across TensorCores (v7x).
            dimension_semantics=("parallel",)),
    )(hidden_states, w2d, b1d, p_mask)


if __name__ == "__main__":
    key = jax.random.PRNGKey(0)
    k_h, k_w, k_b, k_m = jax.random.split(key, 4)

    # Small shapes consistent with the module.
    batch, seq_len, hidden = 2, 8, 32
    hidden_states = jax.random.normal(k_h, (batch, seq_len, hidden), dtype=jnp.float32)
    weight = jax.random.normal(k_w, (1, hidden), dtype=jnp.float32) * 0.02
    bias = jax.random.normal(k_b, (1,), dtype=jnp.float32) * 0.02
    p_mask = (jax.random.uniform(k_m, (batch, seq_len)) < 0.25).astype(jnp.float32)

    out = pooler_start_logits(hidden_states, weight, bias, p_mask)
    out = jax.block_until_ready(out)

    # Pure-JAX reference check (float32 branch).
    ref = jnp.einsum("bsh,h->bs", hidden_states, weight[0]) + bias[0]
    ref = ref * (1.0 - p_mask) - 1e30 * p_mask
    assert out.shape == (batch, seq_len)
    assert jnp.allclose(out, ref, rtol=1e-5, atol=1e-5), "mismatch vs reference (f32)"

    # Also exercise the tiled, lane-dense, bf16 path (multi-step grid).
    B2, S2, H2 = 2, 2048, 128
    hs2 = jax.random.normal(k_h, (B2, S2, H2), dtype=jnp.float32).astype(jnp.bfloat16)
    w2 = jax.random.normal(k_w, (1, H2), dtype=jnp.float32) * 0.02
    b2 = jax.random.normal(k_b, (1,), dtype=jnp.float32) * 0.02
    pm2 = (jax.random.uniform(k_m, (B2, S2)) < 0.25).astype(jnp.float32)

    out2 = jax.block_until_ready(pooler_start_logits(hs2, w2, b2, pm2))
    ref2 = jnp.einsum("bsh,h->bs", hs2.astype(jnp.float32), w2[0]) + b2[0]
    ref2 = ref2 * (1.0 - pm2) - 1e30 * pm2
    assert out2.shape == (B2, S2)
    assert jnp.allclose(out2.astype(jnp.float32), ref2, rtol=2e-2, atol=2e-2), \
        "mismatch vs reference (bf16 tiled)"

    print("KERNEL_OK")
</pallas_src>

<mosaic_0001>
module attributes {stable_mosaic.version = 11 : i64} {
  func.func @_start_logits_kernel(%arg0: i32, %arg1: memref<2x8x32xf32, #tpu.memory_space<vmem>>, %arg2: memref<1x32xf32, #tpu.memory_space<vmem>>, %arg3: memref<1xf32, #tpu.memory_space<smem>>, %arg4: memref<2x8xf32, #tpu.memory_space<vmem>>, %arg5: memref<2x8xf32, #tpu.memory_space<vmem>>) attributes {dimension_semantics = [#tpu.dimension_semantics<parallel>], iteration_bounds = array<i64: 1>, scalar_prefetch = 0 : i64, scratch_operands = 0 : i64, tpu.core_type = #tpu.core_type<tc>, window_params = [{transform_indices = @transform_0, window_bounds = array<i64: 2, 8, 32>}, {pipeline_mode = #tpu.pipeline_mode<synchronous>, transform_indices = @transform_1, window_bounds = array<i64: 1, 32>}, {transform_indices = @transform_2, window_bounds = array<i64: 1>}, {transform_indices = @transform_3, window_bounds = array<i64: 2, 8>}, {transform_indices = @transform_4, window_bounds = array<i64: 2, 8>}]} {
    %c0 = arith.constant 0 : index
    %c0_0 = arith.constant 0 : index
    %c0_1 = arith.constant 0 : index
    %0 = vector.load %arg1[%c0, %c0_0, %c0_1] : memref<2x8x32xf32, #tpu.memory_space<vmem>>, vector<2x8x32xf32>
    %c0_2 = arith.constant 0 : index
    %c0_3 = arith.constant 0 : index
    %1 = vector.load %arg2[%c0_2, %c0_3] : memref<1x32xf32, #tpu.memory_space<vmem>>, vector<1x32xf32>
    %c0_4 = arith.constant 0 : index
    %2 = memref.load %arg3[%c0_4] : memref<1xf32, #tpu.memory_space<smem>>
    %3 = vector.shape_cast %1 : vector<1x32xf32> to vector<1x1x32xf32>
    %4 = vector.broadcast %3 : vector<1x1x32xf32> to vector<2x8x32xf32>
    %5 = arith.mulf %0, %4 : vector<2x8x32xf32>
    %cst = arith.constant dense<0.000000e+00> : vector<2x8xf32>
    %6 = vector.multi_reduction <add>, %5, %cst [2] : vector<2x8x32xf32> to vector<2x8xf32>
    %7 = vector.broadcast %2 : f32 to vector<2x8xf32>
    %8 = arith.addf %6, %7 : vector<2x8xf32>
    %c0_5 = arith.constant 0 : index
    %c0_6 = arith.constant 0 : index
    %9 = vector.load %arg4[%c0_5, %c0_6] : memref<2x8xf32, #tpu.memory_space<vmem>>, vector<2x8xf32>
    %cst_7 = arith.constant 1.000000e+00 : f32
    %10 = vector.broadcast %cst_7 : f32 to vector<2x8xf32>
    %11 = arith.subf %10, %9 : vector<2x8xf32>
    %12 = arith.mulf %8, %11 : vector<2x8xf32>
    %cst_8 = arith.constant 1.000000e+30 : f32
    %13 = vector.broadcast %cst_8 : f32 to vector<2x8xf32>
    %14 = arith.mulf %13, %9 : vector<2x8xf32>
    %15 = arith.subf %12, %14 : vector<2x8xf32>
    %c0_9 = arith.constant 0 : index
    %c0_10 = arith.constant 0 : index
    %16 = vector.load %arg5[%c0_9, %c0_10] : memref<2x8xf32, #tpu.memory_space<vmem>>, vector<2x8xf32>
    tpu.vector_store %arg5[%c0_9, %c0_10], %15 {strides = array<i32>} : memref<2x8xf32, #tpu.memory_space<vmem>>, vector<2x8xf32>,
    return
  }
  func.func @transform_0(%arg0: i32) -> (i32, i32, i32) {
    %c0_i32 = arith.constant 0 : i32
    %c0_i32_0 = arith.constant 0 : i32
    %c0_i32_1 = arith.constant 0 : i32
    return %c0_i32, %arg0, %c0_i32_0 : i32, i32, i32
  }
  func.func @transform_1(%arg0: i32) -> (i32, i32) {
    %c0_i32 = arith.constant 0 : i32
    %c0_i32_0 = arith.constant 0 : i32
    %c0_i32_1 = arith.constant 0 : i32
    return %c0_i32, %c0_i32_0 : i32, i32
  }
  func.func @transform_2(%arg0: i32) -> i32 {
    %c0_i32 = arith.constant 0 : i32
    %c0_i32_0 = arith.constant 0 : i32
    return %c0_i32 : i32
  }
  func.func @transform_3(%arg0: i32) -> (i32, i32) {
    %c0_i32 = arith.constant 0 : i32
    %c0_i32_0 = arith.constant 0 : i32
    return %c0_i32, %arg0 : i32, i32
  }
  func.func @transform_4(%arg0: i32) -> (i32, i32) {
    %c0_i32 = arith.constant 0 : i32
    %c0_i32_0 = arith.constant 0 : i32
    return %c0_i32, %arg0 : i32, i32
  }
}

</mosaic_0001>

<bundles_post_ra>
// kernel: tpu_custom_call.1
= control target key start
LH: loop header
LB: loop body
LE: loop exit
PB: predicated region body
PF: predicated region fallthrough
CT: control target
= control target key end

     0   :  { %10 = vsyncpa [#allocation4], 0  ;;  %s253_s0 = inlined_call_operand.hbm [shape: f32[2,8,32], index: 0, kind: input, shape index: {}]   ;;  %s254_s1 = inlined_call_operand.vmem [shape: f32[1,32], index: 1, kind: input, shape index: {}]   ;;  %s255_s2 = inlined_call_operand.<no memory space> [shape: f32[1], index: 2, kind: input, shape index: {}]   ;;  %s256_s3 = inlined_call_operand.vmem [shape: f32[2,8], index: 3, kind: input, shape index: {}]   ;;  %s257_s4 = inlined_call_operand.hbm [shape: f32[2,8], index: 4, kind: output, shape index: {}]  }
   0x1   :  { %11 = vsyncpa [#allocation5], 0  ;;  %s190_s15 = smov [#allocation3]   ;;  %s142_s19 = scalar_lea.hbm %s253_s0, 256 }
   0x2   :  { %s17_s16 = sshll.u32 %s190_s15, 4  ;;  %p143_p0 = scmp.ne.s32.totalorder %s253_s0, %s142_s19  ;;  %s18_s16 = int_to_ptr.vmem [resolvable:$true] %s17_s16 }
   0x3   :  { %p146_p1 = scmp.lt.u32.totalorder %s142_s19, %s253_s0 }
   0x5   :  { %p148_p2 = pnand %p146_p1, %p143_p0 }
   0x7   :  { %151 = shalt.err (!%p148_p2)
}
   0x8   :  { %s152_s24 = scalar_lea.vmem %s18_s16, 256  ;;  %p157_p4 = scmp.lt.s32.totalorder %s18_s16, %s18_s16 }
   0x9   :  { %p153_p3 = scmp.ne.s32.totalorder %s18_s16, %s152_s24  ;;  %p158_p5 = scmp.lt.s32.totalorder %s152_s24, %s152_s24 }
   0xb   :  { %p159_p6 = por %p158_p5, %p157_p4 }
   0xd   :  { %p160_p7 = pnand %p159_p6, %p153_p3 }
   0xf   :  { %163 = shalt.err (!%p160_p7)
}
  0x10   :  { %s191_s25 = smov 128   ;;  %s192_s26 = smov 8  }
  0x11   :  { %23 = dma.hbm_to_vmem [thread:$0]  %s253_s0, 256, %s18_s16, [#allocation4], %s191_s25, %s191_s25, %s192_s26  }
  0x12   :  { %186 = dma.done.wait [#allocation4], 256  }
  0x13   :  { %187 = vsyncadd [#allocation4], 4294967040  ;;  %v58_v0 = vlaneseq  ;;  %v33_v2 = vld [vmem:[#allocation3] sm:$0xff]  ;;  %vm45_vm0 = vcmask 261120   ;;  %v34_v4 = vld [vmem:[#allocation3 + $0x8] sm:$0xff]  ;;  %v193_v18 = vmov 0   ;;  %v52_v22 = vstv %s255_s2 }
  0x14   :  { %v134_v3 = vld [vmem:[%s254_s1] ss:$0 sm:$0xff]  ;;  %140 = vset.pattern.permute.xlu1 %v193_v18  ;;  %141 = vset.pattern.permute.xlu0 %v193_v18  ;;  %vm114_vm1 = vcmask 1041409   ;;  %vm117_vm2 = vcmask 58368  }
  0x15   :  { %v59_v1 = vshrl.u32 %v58_v0, 7  ;;  %v43_v6 = vmul.f32 %v134_v3, %v33_v2  ;;  %v44_v7 = vmul.f32 %v134_v3, %v34_v4  ;;  %v55_v8 = vld [vmem:[%s256_s3] sm:$0x3]  ;;  %v105_v19 = vand.u32 127, %v58_v0  ;;  %s194_s3 = smov [#allocation6]  }
  0x16   :  { %v56_v9 = vsub.f32 1.0, %v55_v8  ;;  %v76_v15 = vmul.f32 1e+30, %v55_v8  ;;  %s125_s7 = sshll.u32 %s194_s3, 4  ;;  %s126_s7 = int_to_ptr.vmem [resolvable:$true] %s125_s7 }
  0x17   :  { %v60_v5 = vsub.s32 0, %v59_v1  ;;  %v67_v10 = vsub.s32 1, %v59_v1  ;;  %v46_v11 = vsel %vm45_vm0, %v43_v6, 0.0  ;;  %v49_v13 = vsel %vm45_vm0, %v44_v7, 0.0  ;;  %s164_s2 = scalar_lea.vmem %s126_s7, 32  ;;  %p169_p9 = scmp.lt.s32.totalorder %s126_s7, %s126_s7 }
  0x18   :  { %47 = vadd.xlane.f32.xlu0 %v46_v11  ;;  %v108_v20 = vsub.s32 %v105_v19, %v59_v1  ;;  %p165_p8 = scmp.ne.s32.totalorder %s126_s7, %s164_s2  ;;  %p170_p10 = scmp.lt.s32.totalorder %s164_s2, %s164_s2 }
  0x19   :  { %v61_v12 = vrot.slane %v56_v9, %v60_v5  ;;  %v68_v14 = vrot.slane %v56_v9, %v67_v10  ;;  %v88_v16 = vrot.slane %v76_v15, %v67_v10  ;;  %v81_v17 = vrot.slane %v76_v15, %v60_v5 }
  0x1a   :  { %p171_p11 = por %p170_p10, %p169_p9 }
  0x1b   :  { %63 = vbcast.lane.b32.xlu1 %v61_v12, 256 }
  0x1c   :  { %50 = vadd.xlane.f32.xlu0 %v49_v13  ;;  %p172_p12 = pnand %p171_p11, %p165_p8 }
  0x1f   :  { %70 = vbcast.lane.b32.xlu1 %v68_v14, 256 }
  0x23   :  { %90 = vbcast.lane.b32.xlu1 %v88_v16, 256 }
  0x32   :  { %83 = vbcast.lane.b32.xlu0 %v81_v17, 256 }
  0x8d   :  { %v64_v21 = vpop.permute.xlu1 %63 }
  0x91   :  { %v71_v25 = vpop.permute.xlu1 %70 }
  0x95   :  { %v91_v32 = vpop.permute.xlu1 %90 }
  0xa5   :  { %v48_v23 = vpop.xlane.xlu0 %47 }
  0xa6   :  { %v53_v24 = vadd.f32 %v52_v22, %v48_v23 }
  0xa8   :  { %v74_v28 = vmul.f32 %v64_v21, %v53_v24 }
  0xa9   :  { %v51_v26 = vpop.xlane.xlu0 %50 }
  0xaa   :  { %v54_v27 = vadd.f32 %v52_v22, %v51_v26 }
  0xac   :  { %v75_v30 = vmul.f32 %v71_v25, %v54_v27 }
  0xad   :  { %v84_v29 = vpop.permute.xlu0 %83 }
  0xae   :  { %v94_v31 = vsub.f32 %v74_v28, %v84_v29  ;;  %v95_v33 = vsub.f32 %v75_v30, %v91_v32 }
  0xb0   :  { %99 = vperm.xlu1 %140, %v94_v31  }
  0xb4   :  { %102 = vperm.xlu1 %140, %v95_v33  }
 0x12f   :  { %v100_v34 = vpop.permute.xlu1 %99 }
 0x130   :  { %v109_v36 = vrot.slane %v100_v34, %v108_v20 }
 0x133   :  { %v103_v35 = vpop.permute.xlu1 %102 }
 0x134   :  { %v113_v37 = vrot.slane %v103_v35, %v108_v20 }
 0x136   :  { %v115_v38 = vsel %vm114_vm1, %v113_v37, %v109_v36 }
 0x137   :  { %118 = vst.msk [vmem:[#allocation6] sm:$0x3] %vm117_vm2, %v115_v38 }
 0x138   :  { %175 = shalt.err (!%p172_p12)
}
 0x139   :  { %s176_s10 = scalar_lea.hbm %s257_s4, 32 }
 0x13a   :  { %p177_p13 = scmp.ne.s32.totalorder %s257_s4, %s176_s10  ;;  %p180_p0 = scmp.lt.u32.totalorder %s176_s10, %s257_s4 }
 0x13c   :  { %p182_p1 = pnand %p180_p0, %p177_p13 }
 0x13e   :  { %185 = shalt.err (!%p182_p1)
}
 0x13f   :  { %128 = dma.vmem_to_hbm [thread:$0]  %s126_s7, 32, %s257_s4, [#allocation5]  }
 0x140   :  { %188 = dma.done.wait [#allocation5], 32  }
 0x141   :  { %189 = vsyncadd [#allocation5], 4294967264 }
 0x142   :  { %132 = vsyncpa [#allocation4], 1 }
 0x143   :  { %133 = vsyncpa [#allocation5], 1 }

</bundles_post_ra>
